<compile_context>
chip_gen: v6e
topology: v6e:2x2x1
jax: 0.10.0
libtpu: 0.0.40
codegen_flags: <defaults>
</compile_context>

<pallas_src>
import functools

import jax
import jax.numpy as jnp
from jax.experimental import pallas as pl
from jax.experimental.pallas import tpu as pltpu

NUM_CHANNELS = 14
_MAX_N_TILE = 65536                 # lanes per grid step (~4 MiB / f32 input block)
_VMEM_LIMIT_BYTES = 48 * 1024 * 1024
_SMALL_STEP_BYTES = 1 << 20         # below this per-row, use the batched-rows path
_TARGET_STEP_BYTES = 2 << 20        # target bytes moved per grid step


def _pick_fold_width(n_tile):
    """Largest lane-aligned fold width that divides n_tile (else no fold)."""
    for fw in (1024, 512, 256, 128):
        if n_tile % fw == 0:
            return fw
    return n_tile


def _fold_lanes(x, fold_w):
    """Lane-aligned VALU fold of (C, w) -> (C, fold_w).  Requires w % fold_w == 0.

    All slice boundaries are multiples of fold_w (>=128), so no (8,128) tile
    crossings / layout copies; pure VPU adds hidden under the input DMA.
    """
    w = x.shape[-1]
    # Tree-halve while both halves stay multiples of fold_w (shallow dep chain).
    while w > fold_w and (w // 2) % fold_w == 0:
        h = w // 2
        x = x[:, :h] + x[:, h:]
        w = h
    # Linear cleanup for odd chunk counts.
    if w > fold_w:
        acc = x[:, :fold_w]
        for c in range(1, w // fold_w):
            acc = acc + x[:, c * fold_w:(c + 1) * fold_w]
        x = acc
    return x


def _lg_nrmse_stream_kernel(gt_ref, pr_ref, sse_out_ref, sabs_out_ref,
                            sse_acc, sabs_acc, *,
                            n_valid, n_tile, fold_w, needs_mask):
    """Streaming reduction. Blocks: (C, n_tile) inputs, (C, 1) outputs per (split, row)."""
    s = pl.program_id(0)              # N-split index ("parallel")
    nt = pl.program_id(2)             # N-tile index within split ("arbitrary")
    nt_per_split = pl.num_programs(2)

    @pl.when(nt == 0)
    def _init():
        sse_acc[...] = jnp.zeros_like(sse_acc)
        sabs_acc[...] = jnp.zeros_like(sabs_acc)

    gt = gt_ref[...].astype(jnp.float32)          # (C, n_tile)
    pr = pr_ref[...].astype(jnp.float32)
    diff = gt - pr
    sq = diff * diff
    ab = jnp.abs(gt)

    def _accum(sq_v, ab_v):
        sse_acc[...] += _fold_lanes(sq_v, fold_w)
        sabs_acc[...] += _fold_lanes(ab_v, fold_w)

    if needs_mask:
        # Only the globally-last N tile is partial; pay for masking only there.
        is_last_global = jnp.logical_and(s == pl.num_programs(0) - 1,
                                         nt == nt_per_split - 1)

        @pl.when(jnp.logical_not(is_last_global))
        def _full():
            _accum(sq, ab)

        @pl.when(is_last_global)
        def _masked():
            global_nt = s * nt_per_split + nt
            lane = (jax.lax.broadcasted_iota(jnp.int32, sq.shape, 1)
                    + global_nt * n_tile)
            valid = lane < n_valid
            _accum(jnp.where(valid, sq, 0.0), jnp.where(valid, ab, 0.0))
    else:
        _accum(sq, ab)

    @pl.when(nt == nt_per_split - 1)
    def _finalize():
        # Single cross-lane (XLU) reduce per (split, batch-row).
        sse_out_ref[...] = jnp.sum(sse_acc[...], axis=-1, keepdims=True)
        sabs_out_ref[...] = jnp.sum(sabs_acc[...], axis=-1, keepdims=True)


def _lg_nrmse_rows_kernel(gt_ref, pr_ref, sse_out_ref, sabs_out_ref):
    """Small-N path: several batch rows per step, full N in one block."""
    gt = gt_ref[...].astype(jnp.float32)          # (b_tile, C, N)
    pr = pr_ref[...].astype(jnp.float32)
    diff = gt - pr
    sse_out_ref[...] = jnp.sum(diff * diff, axis=-1, keepdims=True)
    sabs_out_ref[...] = jnp.sum(jnp.abs(gt), axis=-1, keepdims=True)


def lg_nrmse_loss(gt, preds, *, max_n_tile=_MAX_N_TILE):
    """gt, preds: (B, 14, ...) arrays (f32 or bf16). Returns scalar f32 score."""
    assert gt.shape == preds.shape
    if gt.ndim > 3:                       # (B, 14, H, W, ...) -> (B, 14, N)
        gt = gt.reshape(gt.shape[0], gt.shape[1], -1)
        preds = preds.reshape(preds.shape[0], preds.shape[1], -1)
    B, C, N = gt.shape
    assert C == NUM_CHANNELS, "loss is defined over exactly 14 channels"

    it_gt = jnp.dtype(gt.dtype).itemsize
    it_pr = jnp.dtype(preds.dtype).itemsize
    cost = pl.CostEstimate(
        flops=5 * B * C * N,
        transcendentals=0,
        bytes_accessed=B * C * N * (it_gt + it_pr) + 2 * B * C * 4,
    )

    n_tile = N if N <= max_n_tile else max_n_tile
    num_nt = pl.cdiv(N, n_tile)

    # ---------------- small-N path: block multiple batch rows per step -------
    row_bytes = 2 * 16 * N * max(it_gt, it_pr)    # 14 channels pad to 16 sublanes
    if num_nt == 1 and row_bytes < _SMALL_STEP_BYTES:
        b_target = min(B, max(1, _TARGET_STEP_BYTES // row_bytes))
        b_tile = 1
        for bt in range(b_target, 0, -1):         # largest divisor of B <= target
            if B % bt == 0:
                b_tile = bt
                break
        sse_out, sabs_out = pl.pallas_call(
            _lg_nrmse_rows_kernel,
            out_shape=(
                jax.ShapeDtypeStruct((B, C, 1), jnp.float32),
                jax.ShapeDtypeStruct((B, C, 1), jnp.float32),
            ),
            grid_spec=pltpu.PrefetchScalarGridSpec(
                num_scalar_prefetch=0,
                grid=(B // b_tile,),
                in_specs=[
                    pl.BlockSpec((b_tile, C, N), lambda i: (i, 0, 0)),
                    pl.BlockSpec((b_tile, C, N), lambda i: (i, 0, 0)),
                ],
                out_specs=[
                    pl.BlockSpec((b_tile, C, 1), lambda i: (i, 0, 0)),
                    pl.BlockSpec((b_tile, C, 1), lambda i: (i, 0, 0)),
                ],
            ),
            compiler_params=pltpu.CompilerParams(
                dimension_semantics=("parallel",),
                vmem_limit_bytes=_VMEM_LIMIT_BYTES,
            ),
            cost_estimate=cost,
        )(gt, preds)
        sse = jnp.sum(sse_out[:, :, 0], axis=0)       # (14,)
        sabs = jnp.sum(sabs_out[:, :, 0], axis=0)     # (14,)

    # ---------------- streaming path -----------------------------------------
    else:
        needs_mask = (N % n_tile) != 0
        # Split the N reduction across two "parallel" grid cells when the batch
        # axis alone cannot load-balance a 2-TC (v7x) chip; no-op elsewhere.
        n_split = 2 if (B % 2 == 1 and num_nt % 2 == 0) else 1
        nt_per_split = num_nt // n_split
        fold_w = _pick_fold_width(n_tile)

        kernel = functools.partial(
            _lg_nrmse_stream_kernel,
            n_valid=N, n_tile=n_tile, fold_w=fold_w, needs_mask=needs_mask)

        in_map = lambda s, b, nt, _nps=nt_per_split: (b, 0, s * _nps + nt)
        out_map = lambda s, b, nt: (s, b, 0, 0)

        sse_out, sabs_out = pl.pallas_call(
            kernel,
            out_shape=(
                jax.ShapeDtypeStruct((n_split, B, C, 1), jnp.float32),
                jax.ShapeDtypeStruct((n_split, B, C, 1), jnp.float32),
            ),
            grid_spec=pltpu.PrefetchScalarGridSpec(
                num_scalar_prefetch=0,
                grid=(n_split, B, nt_per_split),
                in_specs=[
                    pl.BlockSpec((None, C, n_tile), in_map),     # batch dim squeezed
                    pl.BlockSpec((None, C, n_tile), in_map),
                ],
                out_specs=[
                    pl.BlockSpec((None, None, C, 1), out_map),
                    pl.BlockSpec((None, None, C, 1), out_map),
                ],
                scratch_shapes=[
                    pltpu.VMEM((C, fold_w), jnp.float32),
                    pltpu.VMEM((C, fold_w), jnp.float32),
                ],
            ),
            compiler_params=pltpu.CompilerParams(
                dimension_semantics=("parallel", "parallel", "arbitrary"),
                vmem_limit_bytes=_VMEM_LIMIT_BYTES,
            ),
            cost_estimate=cost,
        )(gt, preds)
        sse = jnp.sum(sse_out[:, :, :, 0], axis=(0, 1))     # (14,)
        sabs = jnp.sum(sabs_out[:, :, :, 0], axis=(0, 1))   # (14,)

    nrmse = sse / sabs            # == mse / mean(|gt|); no eps, matches torch
    return 1.2 * jnp.sum(nrmse[:8]) + 1.0 * jnp.sum(nrmse[8:NUM_CHANNELS])


def _reference(gt, preds):
    # Pure-JAX reference mirroring the PyTorch loop.
    gt = gt.astype(jnp.float32)
    preds = preds.astype(jnp.float32)
    nrmses = []
    for idx in range(NUM_CHANNELS):
        mse = jnp.mean((gt[:, idx] - preds[:, idx]) ** 2)
        nrmse = mse / jnp.mean(jnp.abs(gt[:, idx]))
        nrmses.append(nrmse)
    t = jnp.stack(nrmses, 0)
    return 1.2 * jnp.sum(t[:8]) + 1.0 * jnp.sum(t[8:NUM_CHANNELS])


def _check(score, ref):
    assert jnp.allclose(score, ref, rtol=1e-4, atol=1e-5), (score, ref)


if __name__ == "__main__":
    key = jax.random.PRNGKey(0)
    C = NUM_CHANNELS

    # Test 1: small N -> batched-rows path (b_tile = B = 2, single step).
    k1, k2, k3, k4, k5, k6, k7, k8, k9, k10 = jax.random.split(key, 10)
    gt = jax.random.normal(k1, (2, C, 16), dtype=jnp.float32)
    preds = jax.random.normal(k2, (2, C, 16), dtype=jnp.float32)
    score = lg_nrmse_loss(gt, preds)
    jax.block_until_ready(score)
    _check(score, _reference(gt, preds))

    # Test 2: streaming path, masked last tile, no N-split (B=3 odd, num_nt=3 odd).
    gt2 = jax.random.normal(k3, (3, C, 300), dtype=jnp.float32)
    preds2 = jax.random.normal(k4, (3, C, 300), dtype=jnp.float32)
    score2 = lg_nrmse_loss(gt2, preds2, max_n_tile=128)
    jax.block_until_ready(score2)
    _check(score2, _reference(gt2, preds2))

    # Test 3: streaming path, B=1 -> 2-way N split + masked globally-last tile.
    gt3 = jax.random.normal(k5, (1, C, 400), dtype=jnp.float32)
    preds3 = jax.random.normal(k6, (1, C, 400), dtype=jnp.float32)
    score3 = lg_nrmse_loss(gt3, preds3, max_n_tile=128)
    jax.block_until_ready(score3)
    _check(score3, _reference(gt3, preds3))

    # Test 4: streaming path, B=1 -> 2-way N split, no masking (N multiple of tile).
    gt4 = jax.random.normal(k7, (1, C, 512), dtype=jnp.float32)
    preds4 = jax.random.normal(k8, (1, C, 512), dtype=jnp.float32)
    score4 = lg_nrmse_loss(gt4, preds4, max_n_tile=128)
    jax.block_until_ready(score4)
    _check(score4, _reference(gt4, preds4))

    # Test 5: streaming path, single full-N tile with fold (fold_w=1024), init+finalize same step.
    gt5 = jax.random.normal(k9, (2, C, 8192), dtype=jnp.float32)
    preds5 = jax.random.normal(k10, (2, C, 8192), dtype=jnp.float32)
    score5 = lg_nrmse_loss(gt5, preds5)
    jax.block_until_ready(score5)
    _check(score5, _reference(gt5, preds5))

    print("KERNEL_OK")
</pallas_src>

<mosaic_0001>
module attributes {stable_mosaic.version = 11 : i64} {
  func.func @_lg_nrmse_rows_kernel(%arg0: i32, %arg1: memref<2x14x16xf32, #tpu.memory_space<vmem>>, %arg2: memref<2x14x16xf32, #tpu.memory_space<vmem>>, %arg3: memref<2x14x1xf32, #tpu.memory_space<vmem>>, %arg4: memref<2x14x1xf32, #tpu.memory_space<vmem>>) attributes {dimension_semantics = [#tpu.dimension_semantics<parallel>], iteration_bounds = array<i64: 1>, scalar_prefetch = 0 : i64, scratch_operands = 0 : i64, tpu.core_type = #tpu.core_type<tc>, window_params = [{transform_indices = @transform_0, window_bounds = array<i64: 2, 14, 16>}, {transform_indices = @transform_1, window_bounds = array<i64: 2, 14, 16>}, {transform_indices = @transform_2, window_bounds = array<i64: 2, 14, 1>}, {transform_indices = @transform_3, window_bounds = array<i64: 2, 14, 1>}]} {
    %c0 = arith.constant 0 : index
    %c0_0 = arith.constant 0 : index
    %c0_1 = arith.constant 0 : index
    %0 = vector.load %arg1[%c0, %c0_0, %c0_1] : memref<2x14x16xf32, #tpu.memory_space<vmem>>, vector<2x14x16xf32>
    %c0_2 = arith.constant 0 : index
    %c0_3 = arith.constant 0 : index
    %c0_4 = arith.constant 0 : index
    %1 = vector.load %arg2[%c0_2, %c0_3, %c0_4] : memref<2x14x16xf32, #tpu.memory_space<vmem>>, vector<2x14x16xf32>
    %2 = arith.subf %0, %1 : vector<2x14x16xf32>
    %3 = arith.mulf %2, %2 : vector<2x14x16xf32>
    %cst = arith.constant dense<0.000000e+00> : vector<2x14xf32>
    %4 = vector.multi_reduction <add>, %3, %cst [2] : vector<2x14x16xf32> to vector<2x14xf32>
    %5 = vector.shape_cast %4 : vector<2x14xf32> to vector<2x14x1xf32>
    %c0_5 = arith.constant 0 : index
    %c0_6 = arith.constant 0 : index
    %c0_7 = arith.constant 0 : index
    %6 = vector.load %arg3[%c0_5, %c0_6, %c0_7] : memref<2x14x1xf32, #tpu.memory_space<vmem>>, vector<2x14x1xf32>
    tpu.vector_store %arg3[%c0_5, %c0_6, %c0_7], %5 {strides = array<i32>} : memref<2x14x1xf32, #tpu.memory_space<vmem>>, vector<2x14x1xf32>,
    %7 = math.absf %0 : vector<2x14x16xf32>
    %cst_8 = arith.constant dense<0.000000e+00> : vector<2x14xf32>
    %8 = vector.multi_reduction <add>, %7, %cst_8 [2] : vector<2x14x16xf32> to vector<2x14xf32>
    %9 = vector.shape_cast %8 : vector<2x14xf32> to vector<2x14x1xf32>
    %c0_9 = arith.constant 0 : index
    %c0_10 = arith.constant 0 : index
    %c0_11 = arith.constant 0 : index
    %10 = vector.load %arg4[%c0_9, %c0_10, %c0_11] : memref<2x14x1xf32, #tpu.memory_space<vmem>>, vector<2x14x1xf32>
    tpu.vector_store %arg4[%c0_9, %c0_10, %c0_11], %9 {strides = array<i32>} : memref<2x14x1xf32, #tpu.memory_space<vmem>>, vector<2x14x1xf32>,
    return
  }
  func.func @transform_0(%arg0: i32) -> (i32, i32, i32) {
    %c0_i32 = arith.constant 0 : i32
    %c0_i32_0 = arith.constant 0 : i32
    %c0_i32_1 = arith.constant 0 : i32
    return %arg0, %c0_i32, %c0_i32_0 : i32, i32, i32
  }
  func.func @transform_1(%arg0: i32) -> (i32, i32, i32) {
    %c0_i32 = arith.constant 0 : i32
    %c0_i32_0 = arith.constant 0 : i32
    %c0_i32_1 = arith.constant 0 : i32
    return %arg0, %c0_i32, %c0_i32_0 : i32, i32, i32
  }
  func.func @transform_2(%arg0: i32) -> (i32, i32, i32) {
    %c0_i32 = arith.constant 0 : i32
    %c0_i32_0 = arith.constant 0 : i32
    %c0_i32_1 = arith.constant 0 : i32
    return %arg0, %c0_i32, %c0_i32_0 : i32, i32, i32
  }
  func.func @transform_3(%arg0: i32) -> (i32, i32, i32) {
    %c0_i32 = arith.constant 0 : i32
    %c0_i32_0 = arith.constant 0 : i32
    %c0_i32_1 = arith.constant 0 : i32
    return %arg0, %c0_i32, %c0_i32_0 : i32, i32, i32
  }
}

</mosaic_0001>

<bundles_post_ra>
// kernel: tpu_custom_call.1
= control target key start
LH: loop header
LB: loop body
LE: loop exit
PB: predicated region body
PF: predicated region fallthrough
CT: control target
= control target key end

     0   :  { %vm29_vm0 = vcmask 130048   ;;  %vm33_vm1 = vcmask 128000   ;;  %vm43_vm2 = vcmask 7168   ;;  %vm45_vm3 = vcmask 5120   ;;  %s157_s0 = inlined_call_operand.vmem [shape: f32[2,14,16], index: 0, kind: input, shape index: {}]   ;;  %s158_s1 = inlined_call_operand.vmem [shape: f32[2,14,16], index: 1, kind: input, shape index: {}]   ;;  %s159_s2 = inlined_call_operand.vmem [shape: f32[2,14,1], index: 2, kind: output, shape index: {0}]   ;;  %s160_s3 = inlined_call_operand.vmem [shape: f32[2,14,1], index: 3, kind: output, shape index: {1}]  }
   0x1   :  { %v15_v0 = vld [vmem:[%s157_s0 + $0x10] sm:$0xff]  ;;  %v13_v2 = vld [vmem:[%s157_s0] sm:$0xff]  ;;  %v16_v5 = vld [vmem:[%s157_s0 + $0x18] sm:$0x3f] }
   0x2   :  { %v19_v1 = vld [vmem:[%s158_s1 + $0x10] sm:$0xff]  ;;  %v17_v4 = vld [vmem:[%s158_s1] sm:$0xff]  ;;  %v20_v6 = vld [vmem:[%s158_s1 + $0x18] sm:$0x3f]  ;;  %v49_v21 = vand.u32 2147483647, %v13_v2 }
   0x3   :  { %v23_v3 = vsub.f32 %v15_v0, %v19_v1  ;;  %v21_v7 = vsub.f32 %v13_v2, %v17_v4  ;;  %v24_v8 = vsub.f32 %v16_v5, %v20_v6  ;;  %v14_v9 = vld [vmem:[%s157_s0 + $0x8] sm:$0x3f]  ;;  %v52_v23 = vand.u32 2147483647, %v16_v5 }
   0x4   :  { %v18_v10 = vld [vmem:[%s158_s1 + $0x8] sm:$0x3f]  ;;  %v50_v19 = vand.u32 2147483647, %v14_v9  ;;  %v53_v24 = vsel %vm29_vm0, %v49_v21, 0.0 }
   0x5   :  { %v27_v11 = vmul.f32 %v23_v3, %v23_v3  ;;  %v22_v12 = vsub.f32 %v14_v9, %v18_v10  ;;  %v25_v13 = vmul.f32 %v21_v7, %v21_v7  ;;  %v28_v14 = vmul.f32 %v24_v8, %v24_v8 }
   0x6   :  { %v56_v22 = vsel %vm33_vm1, %v50_v19, 0.0  ;;  %v51_v25 = vand.u32 2147483647, %v15_v0  ;;  %v62_v26 = vsel %vm33_vm1, %v52_v23, 0.0 }
   0x7   :  { %v37_v15 = vsel %vm29_vm0, %v27_v11, 0.0  ;;  %v26_v16 = vmul.f32 %v22_v12, %v22_v12  ;;  %v30_v17 = vsel %vm29_vm0, %v25_v13, 0.0  ;;  %v40_v18 = vsel %vm33_vm1, %v28_v14, 0.0 }
   0x8   :  { %38 = vadd.xlane.f32.xlu1 %v37_v15  ;;  %31 = vadd.xlane.f32.xlu0 %v30_v17  ;;  %v59_v27 = vsel %vm29_vm0, %v51_v25, 0.0 }
   0x9   :  { %v34_v20 = vsel %vm33_vm1, %v26_v16, 0.0 }
   0xc   :  { %41 = vadd.xlane.f32.xlu1 %v40_v18  ;;  %35 = vadd.xlane.f32.xlu0 %v34_v20 }
  0x10   :  { %57 = vadd.xlane.f32.xlu1 %v56_v22  ;;  %54 = vadd.xlane.f32.xlu0 %v53_v24 }
  0x14   :  { %63 = vadd.xlane.f32.xlu1 %v62_v26  ;;  %60 = vadd.xlane.f32.xlu0 %v59_v27 }
  0x91   :  { %v39_v28 = vpop.xlane.xlu1 %38  ;;  %v32_v29 = vpop.xlane.xlu0 %31 }
  0x92   :  { %47 = vst.msk [vmem:[%s159_s2 + $0x10] sm:$0xff] %vm43_vm2, %v39_v28  ;;  %44 = vst.msk [vmem:[%s159_s2] sm:$0xff] %vm43_vm2, %v32_v29 }
  0x95   :  { %v42_v30 = vpop.xlane.xlu1 %41  ;;  %v36_v31 = vpop.xlane.xlu0 %35 }
  0x96   :  { %48 = vst.msk [vmem:[%s159_s2 + $0x18] sm:$0x3f] %vm45_vm3, %v42_v30  ;;  %46 = vst.msk [vmem:[%s159_s2 + $0x8] sm:$0x3f] %vm45_vm3, %v36_v31 }
  0x99   :  { %v58_v32 = vpop.xlane.xlu1 %57  ;;  %v55_v33 = vpop.xlane.xlu0 %54 }
  0x9a   :  { %66 = vst.msk [vmem:[%s160_s3 + $0x8] sm:$0x3f] %vm45_vm3, %v58_v32 }
  0x9b   :  { %65 = vst.msk [vmem:[%s160_s3] sm:$0xff] %vm43_vm2, %v55_v33 }
  0x9d   :  { %v64_v34 = vpop.xlane.xlu1 %63  ;;  %v61_v35 = vpop.xlane.xlu0 %60 }
  0x9e   :  { %68 = vst.msk [vmem:[%s160_s3 + $0x18] sm:$0x3f] %vm45_vm3, %v64_v34 }
  0x9f   :  { %67 = vst.msk [vmem:[%s160_s3 + $0x10] sm:$0xff] %vm43_vm2, %v61_v35 }

</bundles_post_ra>
